<compile_context>
chip_gen: v6e
topology: v6e:2x2x1
jax: 0.10.0
libtpu: 0.0.40
codegen_flags: <defaults>
</compile_context>

<pallas_src>
import functools

import jax
import jax.numpy as jnp
import numpy as np
from jax.experimental import pallas as pl
from jax.experimental.pallas import tpu as pltpu


def _textcnn_kernel(x_ref, wp_ref, bp_ref, mask_ref, wfc_ref, bfc_ref,
                    out_ref, col_ref, *, L, H):
    """One batch tile of the full forward pass.

    x_ref    : (TB, L, H)     input tile (compute dtype, channels-last)
    wp_ref   : (K4p, H3p)     lane-packed conv weights, rows = (tap, in-ch)
    bp_ref   : (1, H3p)       packed conv bias (f32)
    mask_ref : (Tp, H3p)      additive validity mask: 0 valid, -1e30 invalid
    wfc_ref  : (H3p, Cpad)    fc weight (in, out), zero-padded to 128 lanes
    bfc_ref  : (1, Cpad)      fc bias (f32), zero-padded
    out_ref  : (TB, Cpad)     logits (f32)
    col_ref  : (TB, Tp, K4p)  f32 VMEM scratch: im2col LHS (tap-major lanes)
    """
    TB, Tp, K4p = col_ref.shape
    H3p = wp_ref.shape[1]

    # ---- zero only the pad rows of the im2col scratch ----------------------
    # Row 0 (tap 0's left pad) and rows >= L-2 (windows that reach past the
    # sequence). Rows 1..L-3 are fully overwritten below.
    col_ref[:, 0:1, :] = jnp.zeros((TB, 1, K4p), jnp.float32)
    z0 = max(L - 2, 0)
    col_ref[:, z0:, :] = jnp.zeros((TB, Tp - z0, K4p), jnp.float32)
    if K4p > 4 * H:                       # lane padding of the contraction dim
        col_ref[:, :, 4 * H:] = jnp.zeros((TB, Tp, K4p - 4 * H), jnp.float32)

    # ---- single im2col pass: tap k lands in lanes [k*H, (k+1)*H) -----------
    # padding=1 is realised here (row 0 / the zeroed tail are the pad rows),
    # so x is read from HBM exactly once, unpadded.
    xf = x_ref[...].astype(jnp.float32)                  # (TB, L, H)
    col_ref[:, 1:L + 1, 0 * H:1 * H] = xf                # tap 0 (left zero pad)
    col_ref[:, 0:L, 1 * H:2 * H] = xf                    # tap 1
    if L >= 2:
        col_ref[:, 0:L - 1, 2 * H:3 * H] = xf[:, 1:, :]  # tap 2
    if L >= 3:
        col_ref[:, 0:L - 2, 3 * H:4 * H] = xf[:, 2:, :]  # tap 3

    # ---- ONE MXU matmul, K = 4H, covering all taps of all three branches ---
    lhs = col_ref[...].reshape(TB * Tp, K4p).astype(wp_ref.dtype)
    acc = jnp.dot(lhs, wp_ref[...], preferred_element_type=jnp.float32)
    acc = acc.reshape(TB, Tp, H3p) + mask_ref[...]       # additive -1e30 mask

    # ---- time max first, then bias + ReLU (exactly equivalent) -------------
    feat = jnp.maximum(jnp.max(acc, axis=1) + bp_ref[...], 0.0)     # (TB, H3p)

    # ---- classifier head, lane-dense (Cpad = multiple of 128) store --------
    out_ref[...] = (jnp.dot(feat.astype(wfc_ref.dtype), wfc_ref[...],
                            preferred_element_type=jnp.float32)
                    + bfc_ref[...])


def pack_params(params, compute_dtype):
    """PyTorch-layout params -> lane-packed kernel layout (one-time prep)."""
    H = params['b1'].shape[0]
    C = params['b_fc'].shape[0]
    h3 = 3 * H
    h3p = ((h3 + 127) // 128) * 128           # lane-padded conv output width
    k4p = ((4 * H + 127) // 128) * 128        # lane-padded contraction width
    c_pad = ((C + 127) // 128) * 128          # lane-dense classifier width

    wp = np.zeros((k4p, h3p), np.float32)
    for j, (name, K) in enumerate((('w1', 2), ('w2', 3), ('w3', 4))):
        w = np.asarray(params[name])          # PyTorch Conv1d: (out, in, K)
        for k in range(K):
            wp[k * H:(k + 1) * H, j * H:(j + 1) * H] = w[:, :, k].T   # (in,out)

    bp = np.zeros((1, h3p), np.float32)
    bp[0, 0:H] = np.asarray(params['b1'])
    bp[0, H:2 * H] = np.asarray(params['b2'])
    bp[0, 2 * H:3 * H] = np.asarray(params['b3'])

    wfc = np.zeros((h3p, c_pad), np.float32)
    wfc[:h3, :C] = np.asarray(params['w_fc']).T
    bfc = np.zeros((1, c_pad), np.float32)
    bfc[0, :C] = np.asarray(params['b_fc'])

    packed = {'wp': jnp.asarray(wp, compute_dtype),
              'bp': jnp.asarray(bp, jnp.float32),
              'wfc': jnp.asarray(wfc, compute_dtype),
              'bfc': jnp.asarray(bfc, jnp.float32)}
    return packed, {'h3p': h3p, 'k4p': k4p, 'c_pad': c_pad}


def textcnn_forward(x, params, *, compute_dtype=jnp.bfloat16, batch_tile=32):
    """x: (B, L, H) -> logits (B, C).

    compute_dtype: MXU operand dtype.  bf16 is the fast path on v5e/v6e/v7x
    (native MXU dtype, half the HBM traffic); accumulation / mask / bias /
    ReLU stay f32.  Pass jnp.float32 for a strict-accuracy path.
    """
    B, L, H = x.shape
    C = params['b_fc'].shape[0]
    packed, d = pack_params(params, compute_dtype)
    h3p, k4p, c_pad = d['h3p'], d['k4p'], d['c_pad']

    t_pad = ((L + 1 + 7) // 8) * 8            # 8-aligned conv-output length

    # Precomputed additive validity mask: branch j (kernel size 2+j) has
    # L + 1 - j valid output positions; everything else gets -1e30 so the
    # time-max ignores it (then ReLU clamps any untouched branch to 0).
    t = np.arange(t_pad)[:, None]
    lane = np.arange(h3p)[None, :]
    branch = np.minimum(lane // H, 3)
    mask = jnp.asarray(np.where(t + branch <= L, 0.0, -1e30), jnp.float32)

    # Batch tile: big enough to fill the MXU M dim (M = tb * t_pad), but keep
    # >= 2 "parallel" grid steps (both v7x TensorCores, pipelined input DMA)
    # whenever the batch is large enough to keep 8-aligned tiles.
    tb = min(batch_tile, B)
    if tb >= B and B >= 16:
        tb = max(8, ((B // 2 + 7) // 8) * 8)

    kernel = functools.partial(_textcnn_kernel, L=L, H=H)

    out = pl.pallas_call(
        kernel,
        out_shape=jax.ShapeDtypeStruct((B, c_pad), jnp.float32),
        grid_spec=pltpu.PrefetchScalarGridSpec(
            num_scalar_prefetch=0,
            grid=(pl.cdiv(B, tb),),
            in_specs=[
                pl.BlockSpec((tb, L, H), lambda i: (i, 0, 0)),     # x (batch tiled)
                pl.BlockSpec((k4p, h3p), lambda i: (0, 0)),        # packed conv W
                pl.BlockSpec((1, h3p), lambda i: (0, 0)),          # packed conv b
                pl.BlockSpec((t_pad, h3p), lambda i: (0, 0)),      # additive mask
                pl.BlockSpec((h3p, c_pad), lambda i: (0, 0)),      # fc W (padded)
                pl.BlockSpec((1, c_pad), lambda i: (0, 0)),        # fc b (padded)
            ],
            out_specs=pl.BlockSpec((tb, c_pad), lambda i: (i, 0)),
            scratch_shapes=[pltpu.VMEM((tb, t_pad, k4p), jnp.float32)],
        ),
        compiler_params=pltpu.CompilerParams(
            dimension_semantics=("parallel",),      # megacore batch sharding
            vmem_limit_bytes=48 * 1024 * 1024,      # within v7x's 64 MiB physical
        ),
    )(x.astype(compute_dtype), packed['wp'], packed['bp'], mask,
      packed['wfc'], packed['bfc'])

    return out[:, :C]


def init_params(key, H, C):
    """Deterministic synthetic parameters in PyTorch layout."""
    ks = jax.random.split(key, 8)
    s = 0.05
    return {
        'w1': jax.random.normal(ks[0], (H, H, 2), jnp.float32) * s,
        'b1': jax.random.normal(ks[1], (H,), jnp.float32) * s,
        'w2': jax.random.normal(ks[2], (H, H, 3), jnp.float32) * s,
        'b2': jax.random.normal(ks[3], (H,), jnp.float32) * s,
        'w3': jax.random.normal(ks[4], (H, H, 4), jnp.float32) * s,
        'b3': jax.random.normal(ks[5], (H,), jnp.float32) * s,
        'w_fc': jax.random.normal(ks[6], (C, 3 * H), jnp.float32) * s,
        'b_fc': jax.random.normal(ks[7], (C,), jnp.float32) * s,
    }


def reference_forward(x, params):
    """Pure-JAX mirror of the PyTorch forward (NCW Conv1d, PyTorch layout)."""
    xc = jnp.transpose(x, (0, 2, 1))                      # (B, H, L) == NCW

    def branch(w, b):
        y = jax.lax.conv_general_dilated(
            xc, w, window_strides=(1,), padding=[(1, 1)],
            dimension_numbers=('NCH', 'OIH', 'NCH'))
        y = jnp.maximum(y + b.reshape(1, -1, 1), 0.0)
        return jnp.max(y, axis=-1)                        # (B, H)

    o1 = branch(params['w1'], params['b1'])
    o2 = branch(params['w2'], params['b2'])
    o3 = branch(params['w3'], params['b3'])
    feat = jnp.concatenate([o1, o2, o3], axis=1)          # (B, 3H)
    return feat @ params['w_fc'].T + params['b_fc']


if __name__ == "__main__":
    B, L, H, C = 2, 8, 32, 4          # batch, seq_len, hidden_size, num_classes
    key = jax.random.PRNGKey(0)
    kx, kp = jax.random.split(key)
    x = jax.random.normal(kx, (B, L, H), jnp.float32)
    params = init_params(kp, H, C)

    ref = reference_forward(x, params)

    # Strict check with f32 MXU operands.
    out_f32 = jax.block_until_ready(
        textcnn_forward(x, params, compute_dtype=jnp.float32))
    np.testing.assert_allclose(np.asarray(out_f32), np.asarray(ref),
                               rtol=1e-4, atol=1e-4)

    # Default (bf16 operand) fast path: loose check.
    out_bf16 = jax.block_until_ready(textcnn_forward(x, params))
    np.testing.assert_allclose(np.asarray(out_bf16), np.asarray(ref),
                               rtol=5e-2, atol=5e-2)

    print("KERNEL_OK")
</pallas_src>

<mosaic_0001>
module attributes {stable_mosaic.version = 11 : i64} {
  func.func @_textcnn_kernel(%arg0: i32, %arg1: memref<2x8x32xf32, #tpu.memory_space<vmem>>, %arg2: memref<128x128xf32, #tpu.memory_space<vmem>>, %arg3: memref<1x128xf32, #tpu.memory_space<vmem>>, %arg4: memref<16x128xf32, #tpu.memory_space<vmem>>, %arg5: memref<128x128xf32, #tpu.memory_space<vmem>>, %arg6: memref<1x128xf32, #tpu.memory_space<vmem>>, %arg7: memref<2x128xf32, #tpu.memory_space<vmem>>, %arg8: memref<2x16x128xf32, #tpu.memory_space<vmem>>) attributes {dimension_semantics = [#tpu.dimension_semantics<parallel>], iteration_bounds = array<i64: 1>, scalar_prefetch = 0 : i64, scratch_operands = 1 : i64, tpu.core_type = #tpu.core_type<tc>, window_params = [{transform_indices = @transform_0, window_bounds = array<i64: 2, 8, 32>}, {pipeline_mode = #tpu.pipeline_mode<synchronous>, transform_indices = @transform_1, window_bounds = array<i64: 128, 128>}, {pipeline_mode = #tpu.pipeline_mode<synchronous>, transform_indices = @transform_2, window_bounds = array<i64: 1, 128>}, {pipeline_mode = #tpu.pipeline_mode<synchronous>, transform_indices = @transform_3, window_bounds = array<i64: 16, 128>}, {pipeline_mode = #tpu.pipeline_mode<synchronous>, transform_indices = @transform_4, window_bounds = array<i64: 128, 128>}, {pipeline_mode = #tpu.pipeline_mode<synchronous>, transform_indices = @transform_5, window_bounds = array<i64: 1, 128>}, {transform_indices = @transform_6, window_bounds = array<i64: 2, 128>}]} {
    %cst = arith.constant 0.000000e+00 : f32
    %0 = vector.broadcast %cst : f32 to vector<2x1x128xf32>
    %c0 = arith.constant 0 : index
    %c0_0 = arith.constant 0 : index
    %c0_1 = arith.constant 0 : index
    %1 = vector.load %arg8[%c0, %c0_0, %c0_1] : memref<2x16x128xf32, #tpu.memory_space<vmem>>, vector<2x1x128xf32>
    tpu.vector_store %arg8[%c0, %c0_0, %c0_1], %0 {strides = array<i32>} : memref<2x16x128xf32, #tpu.memory_space<vmem>>, vector<2x1x128xf32>,
    %cst_2 = arith.constant 0.000000e+00 : f32
    %2 = vector.broadcast %cst_2 : f32 to vector<2x10x128xf32>
    %c0_3 = arith.constant 0 : index
    %c6 = arith.constant 6 : index
    %c0_4 = arith.constant 0 : index
    %3 = vector.load %arg8[%c0_3, %c6, %c0_4] : memref<2x16x128xf32, #tpu.memory_space<vmem>>, vector<2x10x128xf32>
    tpu.vector_store %arg8[%c0_3, %c6, %c0_4], %2 {strides = array<i32>} : memref<2x16x128xf32, #tpu.memory_space<vmem>>, vector<2x10x128xf32>,
    %c0_5 = arith.constant 0 : index
    %c0_6 = arith.constant 0 : index
    %c0_7 = arith.constant 0 : index
    %4 = vector.load %arg1[%c0_5, %c0_6, %c0_7] : memref<2x8x32xf32, #tpu.memory_space<vmem>>, vector<2x8x32xf32>
    %c0_8 = arith.constant 0 : index
    %c1 = arith.constant 1 : index
    %c0_9 = arith.constant 0 : index
    %5 = vector.load %arg8[%c0_8, %c1, %c0_9] : memref<2x16x128xf32, #tpu.memory_space<vmem>>, vector<2x8x32xf32>
    tpu.vector_store %arg8[%c0_8, %c1, %c0_9], %4 {strides = array<i32>} : memref<2x16x128xf32, #tpu.memory_space<vmem>>, vector<2x8x32xf32>,
    %c0_10 = arith.constant 0 : index
    %c0_11 = arith.constant 0 : index
    %c32 = arith.constant 32 : index
    %6 = vector.load %arg8[%c0_10, %c0_11, %c32] : memref<2x16x128xf32, #tpu.memory_space<vmem>>, vector<2x8x32xf32>
    tpu.vector_store %arg8[%c0_10, %c0_11, %c32], %4 {strides = array<i32>} : memref<2x16x128xf32, #tpu.memory_space<vmem>>, vector<2x8x32xf32>,
    %7 = vector.extract_strided_slice %4 {offsets = [0, 1, 0], sizes = [2, 7, 32], strides = [1, 1, 1]} : vector<2x8x32xf32> to vector<2x7x32xf32>
    %c0_12 = arith.constant 0 : index
    %c0_13 = arith.constant 0 : index
    %c64 = arith.constant 64 : index
    %8 = vector.load %arg8[%c0_12, %c0_13, %c64] : memref<2x16x128xf32, #tpu.memory_space<vmem>>, vector<2x7x32xf32>
    tpu.vector_store %arg8[%c0_12, %c0_13, %c64], %7 {strides = array<i32>} : memref<2x16x128xf32, #tpu.memory_space<vmem>>, vector<2x7x32xf32>,
    %9 = vector.extract_strided_slice %4 {offsets = [0, 2, 0], sizes = [2, 6, 32], strides = [1, 1, 1]} : vector<2x8x32xf32> to vector<2x6x32xf32>
    %c0_14 = arith.constant 0 : index
    %c0_15 = arith.constant 0 : index
    %c96 = arith.constant 96 : index
    %10 = vector.load %arg8[%c0_14, %c0_15, %c96] : memref<2x16x128xf32, #tpu.memory_space<vmem>>, vector<2x6x32xf32>
    tpu.vector_store %arg8[%c0_14, %c0_15, %c96], %9 {strides = array<i32>} : memref<2x16x128xf32, #tpu.memory_space<vmem>>, vector<2x6x32xf32>,
    %c0_16 = arith.constant 0 : index
    %c0_17 = arith.constant 0 : index
    %c0_18 = arith.constant 0 : index
    %11 = vector.load %arg8[%c0_16, %c0_17, %c0_18] : memref<2x16x128xf32, #tpu.memory_space<vmem>>, vector<2x16x128xf32>
    %12 = vector.shape_cast %11 : vector<2x16x128xf32> to vector<32x128xf32>
    %c0_19 = arith.constant 0 : index
    %c0_20 = arith.constant 0 : index
    %13 = vector.load %arg2[%c0_19, %c0_20] : memref<128x128xf32, #tpu.memory_space<vmem>>, vector<128x128xf32>
    %cst_21 = arith.constant dense<0.000000e+00> : vector<32x128xf32>
    %14 = tpu.matmul %12, %13, %cst_21 {dimension_numbers = #tpu.dot_dimension_numbers<[1], [0], [0], [1], [0, 0, 1, 1], [], []>} : vector<32x128xf32>, vector<128x128xf32>, vector<32x128xf32> -> vector<32x128xf32>
    %15 = vector.shape_cast %14 : vector<32x128xf32> to vector<2x16x128xf32>
    %c0_22 = arith.constant 0 : index
    %c0_23 = arith.constant 0 : index
    %16 = vector.load %arg4[%c0_22, %c0_23] : memref<16x128xf32, #tpu.memory_space<vmem>>, vector<16x128xf32>
    %17 = vector.shape_cast %16 : vector<16x128xf32> to vector<1x16x128xf32>
    %18 = vector.broadcast %17 : vector<1x16x128xf32> to vector<2x16x128xf32>
    %19 = arith.addf %15, %18 : vector<2x16x128xf32>
    %cst_24 = arith.constant dense<0xFF800000> : vector<2x128xf32>
    %20 = vector.multi_reduction <maximumf>, %19, %cst_24 [1] : vector<2x16x128xf32> to vector<2x128xf32>
    %c0_25 = arith.constant 0 : index
    %c0_26 = arith.constant 0 : index
    %21 = vector.load %arg3[%c0_25, %c0_26] : memref<1x128xf32, #tpu.memory_space<vmem>>, vector<1x128xf32>
    %22 = vector.broadcast %21 : vector<1x128xf32> to vector<2x128xf32>
    %23 = arith.addf %20, %22 : vector<2x128xf32>
    %cst_27 = arith.constant 0.000000e+00 : f32
    %24 = vector.broadcast %cst_27 : f32 to vector<2x128xf32>
    %25 = arith.maximumf %23, %24 : vector<2x128xf32>
    %c0_28 = arith.constant 0 : index
    %c0_29 = arith.constant 0 : index
    %26 = vector.load %arg5[%c0_28, %c0_29] : memref<128x128xf32, #tpu.memory_space<vmem>>, vector<128x128xf32>
    %cst_30 = arith.constant dense<0.000000e+00> : vector<2x128xf32>
    %27 = tpu.matmul %25, %26, %cst_30 {dimension_numbers = #tpu.dot_dimension_numbers<[1], [0], [0], [1], [0, 0, 1, 1], [], []>} : vector<2x128xf32>, vector<128x128xf32>, vector<2x128xf32> -> vector<2x128xf32>
    %c0_31 = arith.constant 0 : index
    %c0_32 = arith.constant 0 : index
    %28 = vector.load %arg6[%c0_31, %c0_32] : memref<1x128xf32, #tpu.memory_space<vmem>>, vector<1x128xf32>
    %29 = vector.broadcast %28 : vector<1x128xf32> to vector<2x128xf32>
    %30 = arith.addf %27, %29 : vector<2x128xf32>
    %c0_33 = arith.constant 0 : index
    %c0_34 = arith.constant 0 : index
    %31 = vector.load %arg7[%c0_33, %c0_34] : memref<2x128xf32, #tpu.memory_space<vmem>>, vector<2x128xf32>
    tpu.vector_store %arg7[%c0_33, %c0_34], %30 {strides = array<i32>} : memref<2x128xf32, #tpu.memory_space<vmem>>, vector<2x128xf32>,
    return
  }
  func.func @transform_0(%arg0: i32) -> (i32, i32, i32) {
    %c0_i32 = arith.constant 0 : i32
    %c0_i32_0 = arith.constant 0 : i32
    %c0_i32_1 = arith.constant 0 : i32
    return %arg0, %c0_i32, %c0_i32_0 : i32, i32, i32
  }
  func.func @transform_1(%arg0: i32) -> (i32, i32) {
    %c0_i32 = arith.constant 0 : i32
    %c0_i32_0 = arith.constant 0 : i32
    %c0_i32_1 = arith.constant 0 : i32
    return %c0_i32, %c0_i32_0 : i32, i32
  }
  func.func @transform_2(%arg0: i32) -> (i32, i32) {
    %c0_i32 = arith.constant 0 : i32
    %c0_i32_0 = arith.constant 0 : i32
    %c0_i32_1 = arith.constant 0 : i32
    return %c0_i32, %c0_i32_0 : i32, i32
  }
  func.func @transform_3(%arg0: i32) -> (i32, i32) {
    %c0_i32 = arith.constant 0 : i32
    %c0_i32_0 = arith.constant 0 : i32
    %c0_i32_1 = arith.constant 0 : i32
    return %c0_i32, %c0_i32_0 : i32, i32
  }
  func.func @transform_4(%arg0: i32) -> (i32, i32) {
    %c0_i32 = arith.constant 0 : i32
    %c0_i32_0 = arith.constant 0 : i32
    %c0_i32_1 = arith.constant 0 : i32
    return %c0_i32, %c0_i32_0 : i32, i32
  }
  func.func @transform_5(%arg0: i32) -> (i32, i32) {
    %c0_i32 = arith.constant 0 : i32
    %c0_i32_0 = arith.constant 0 : i32
    %c0_i32_1 = arith.constant 0 : i32
    return %c0_i32, %c0_i32_0 : i32, i32
  }
  func.func @transform_6(%arg0: i32) -> (i32, i32) {
    %c0_i32 = arith.constant 0 : i32
    %c0_i32_0 = arith.constant 0 : i32
    return %arg0, %c0_i32 : i32, i32
  }
}

</mosaic_0001>

<bundles_post_ra>
// kernel: tpu_custom_call.1
= control target key start
LH: loop header
LB: loop body
LE: loop exit
PB: predicated region body
PF: predicated region fallthrough
CT: control target
= control target key end

     0   :  { %11 = vsyncpa [#allocation4], 0  ;;  %s707_s0 = inlined_call_operand.hbm [shape: f32[2,8,32], index: 0, kind: input, shape index: {}]   ;;  %s708_s1 = inlined_call_operand.hbm [shape: f32[128,128], index: 1, kind: input, shape index: {}]   ;;  %s709_s2 = inlined_call_operand.vmem [shape: f32[1,128], index: 2, kind: input, shape index: {}]   ;;  %s710_s3 = inlined_call_operand.hbm [shape: f32[16,128], index: 3, kind: input, shape index: {}]   ;;  %s711_s4 = inlined_call_operand.hbm [shape: f32[128,128], index: 4, kind: input, shape index: {}]   ;;  %s712_s5 = inlined_call_operand.vmem [shape: f32[1,128], index: 5, kind: input, shape index: {}]   ;;  %s713_s6 = inlined_call_operand.hbm [shape: f32[2,128], index: 6, kind: output, shape index: {}]  }
   0x1   :  { %12 = vsyncpa [#allocation7], 0 }
   0x2   :  { %13 = vsyncpa [#allocation10], 0 }
   0x3   :  { %14 = vsyncpa [#allocation5], 0  ;;  %s604_s21 = smov [#allocation6]   ;;  %s605_s23 = smov [#allocation3]  }
   0x4   :  { %s32_s22 = sshll.u32 %s604_s21, 4  ;;  %s20_s24 = sshll.u32 %s605_s23, 4  ;;  %s33_s22 = int_to_ptr.vmem [resolvable:$true] %s32_s22  ;;  %s21_s24 = int_to_ptr.vmem [resolvable:$true] %s20_s24 }
   0x5   :  { %s504_s25 = scalar_lea.vmem %s33_s22, 2048  ;;  %p509_p1 = scmp.lt.s32.totalorder %s33_s22, %s33_s22 }
   0x6   :  { %p505_p0 = scmp.ne.s32.totalorder %s33_s22, %s504_s25  ;;  %p510_p2 = scmp.lt.s32.totalorder %s504_s25, %s504_s25 }
   0x8   :  { %p511_p3 = por %p510_p2, %p509_p1 }
   0xa   :  { %p512_p4 = pnand %p511_p3, %p505_p0 }
   0xc   :  { %515 = shalt.err (!%p512_p4)
}
   0xd   :  { %s606_s26 = smov 128   ;;  %s607_s27 = smov 8  }
   0xe   :  { %38 = dma.hbm_to_vmem [thread:$0]  %s708_s1, 2048, %s33_s22, [#allocation7], %s606_s26, %s606_s26, %s607_s27  }
   0xf   :  { %s524_s30 = scalar_lea.vmem %s21_s24, 256  ;;  %p529_p6 = scmp.lt.s32.totalorder %s21_s24, %s21_s24 }
  0x10   :  { %p525_p5 = scmp.ne.s32.totalorder %s21_s24, %s524_s30  ;;  %p530_p7 = scmp.lt.s32.totalorder %s524_s30, %s524_s30 }
  0x12   :  { %p531_p8 = por %p530_p7, %p529_p6 }
  0x14   :  { %p532_p9 = pnand %p531_p8, %p525_p5 }
  0x16   :  { %535 = shalt.err (!%p532_p9)
}
  0x17   :  { %26 = dma.hbm_to_vmem [thread:$0]  %s707_s0, 256, %s21_s24, [#allocation4], %s606_s26, %s606_s26, %s607_s27  }
  0x18   :  { %s608_s9 = smov [#allocation8]   ;;  %s609_s11 = smov [#allocation9]  }
  0x19   :  { %s46_s10 = sshll.u32 %s608_s9, 4  ;;  %s58_s12 = sshll.u32 %s609_s11, 4  ;;  %s47_s10 = int_to_ptr.vmem [resolvable:$true] %s46_s10  ;;  %s59_s12 = int_to_ptr.vmem [resolvable:$true] %s58_s12 }
  0x1a   :  { %s544_s1 = scalar_lea.vmem %s47_s10, 256  ;;  %p549_p11 = scmp.lt.s32.totalorder %s47_s10, %s47_s10 }
  0x1b   :  { %p545_p10 = scmp.ne.s32.totalorder %s47_s10, %s544_s1  ;;  %p550_p12 = scmp.lt.s32.totalorder %s544_s1, %s544_s1 }
  0x1d   :  { %p551_p13 = por %p550_p12, %p549_p11 }
  0x1f   :  { %p552_p0 = pnand %p551_p13, %p545_p10 }
  0x21   :  { %555 = shalt.err (!%p552_p0)
}
  0x22   :  { %52 = dma.hbm_to_vmem [thread:$0]  %s710_s3, 256, %s47_s10, [#allocation7], %s606_s26, %s606_s26, %s607_s27  }
  0x23   :  { %s564_s0 = scalar_lea.vmem %s59_s12, 2048  ;;  %p569_p2 = scmp.lt.s32.totalorder %s59_s12, %s59_s12 }
  0x24   :  { %p565_p1 = scmp.ne.s32.totalorder %s59_s12, %s564_s0  ;;  %p570_p3 = scmp.lt.s32.totalorder %s564_s0, %s564_s0 }
  0x26   :  { %p571_p4 = por %p570_p3, %p569_p2 }
  0x28   :  { %p572_p5 = pnand %p571_p4, %p565_p1 }
  0x2a   :  { %575 = shalt.err (!%p572_p5)
}
  0x2b   :  { %64 = dma.hbm_to_vmem [thread:$0]  %s711_s4, 2048, %s59_s12, [#allocation10], %s606_s26, %s606_s26, %s607_s27  }
  0x2c   :  { %596 = dma.done.wait [#allocation4], 256  }
  0x2d   :  { %597 = vsyncadd [#allocation4], 4294967040 }
  0x2e   :  { %598 = dma.done.wait [#allocation7], 2304  }
  0x2f   :  { %599 = vsyncadd [#allocation7], 4294964992 }
  0x30   :  { %600 = dma.done.wait [#allocation10], 2048  }
  0x31   :  { %601 = vsyncadd [#allocation10], 4294965248  ;;  %v610_v0 = vmov 0.0   ;;  %vm87_vm0 = vcmask 261120   ;;  %v85_v1 = vld [vmem:[#allocation3] sm:$0xff]  ;;  %v86_v2 = vld [vmem:[#allocation3 + $0x8] sm:$0xff] }
  0x32   :  { %81 = vst [vmem:[#allocation2 + $0x6] sm:$0xff] %v610_v0  ;;  %79 = vst [vmem:[#allocation2] sm:$0x1] %v610_v0  ;;  %449 = vmatprep.subr.mxu1 %v610_v0  ;;  %v138_v3 = vld [vmem:[#allocation6 + $0x78] sm:$0xff]  ;;  %s611_s3 = smov 32   ;;  %s612_s4 = smov 96  }
  0x33   :  { %80 = vst [vmem:[#allocation2 + $0x10] sm:$0x1] %v610_v0  ;;  %82 = vst [vmem:[#allocation2 + $0xe] sm:$0x3] %v610_v0  ;;  %92 = vrot.lane.b32.xlu0 %v85_v1, %s611_s3  ;;  %110 = vrot.lane.b32.xlu1 %v85_v1, %s612_s4  ;;  %v137_v4 = vld [vmem:[#allocation6 + $0x70] sm:$0xff]  ;;  %v136_v5 = vld [vmem:[#allocation6 + $0x68] sm:$0xff] }
  0x34   :  { %83 = vst [vmem:[#allocation2 + $0x16] sm:$0xff] %v610_v0  ;;  %84 = vst [vmem:[#allocation2 + $0x1e] sm:$0x3] %v610_v0  ;;  %411 = vmatprep.subr.mxu0 %v138_v3  ;;  %s613_s17 = smov 64   ;;  %v270_v6 = vld [vmem:[#allocation9 + $0x78] sm:$0xff]  ;;  %v135_v7 = vld [vmem:[#allocation6 + $0x60] sm:$0xff] }
  0x35   :  { %88 = vst.msk [vmem:[#allocation2 + $0x1] sm:$0xff] %vm87_vm0, %v85_v1  ;;  %89 = vst.msk [vmem:[#allocation2 + $0x11] sm:$0xff] %vm87_vm0, %v86_v2  ;;  %412 = vmatpush3.msra.mxu0 %v138_v3  ;;  %450 = vmatpush3.msra.mxu1 %v270_v6  ;;  %v134_v8 = vld [vmem:[#allocation6 + $0x58] sm:$0xff]  ;;  %v133_v9 = vld [vmem:[#allocation6 + $0x50] sm:$0xff]  ;;  %vm98_vm1 = vcmask 523520   ;;  %vm107_vm2 = vcmask 785921  }
  0x36   :  { %413 = vmatprep.subr.mxu0 %v137_v4  ;;  %451 = vmatprep.subr.mxu1 %v610_v0  ;;  %v132_v10 = vld [vmem:[#allocation6 + $0x48] sm:$0xff]  ;;  %v131_v11 = vld [vmem:[#allocation6 + $0x40] sm:$0xff]  ;;  %v130_v12 = vld [vmem:[#allocation6 + $0x38] sm:$0xff]  ;;  %vm116_vm3 = vcmask 1048322   ;;  %vm614_vm4 = vmmov 0   ;;  %vm281_vm5 = vcmask 1041409  }
  0x37   :  { %101 = vrot.lane.b32.xlu0 %v85_v1, %s613_s17  ;;  %94 = vrot.lane.b32.xlu1 %v86_v2, %s611_s3  ;;  %v129_v13 = vld [vmem:[#allocation6 + $0x30] sm:$0xff]  ;;  %v128_v14 = vld [vmem:[#allocation6 + $0x28] sm:$0xff]  ;;  %v127_v15 = vld [vmem:[#allocation6 + $0x20] sm:$0xff]  ;;  %s615_s22 = smov [#allocation11]  }
  0x38   :  { %414 = vmatpush3.msra.mxu0 %v137_v4  ;;  %v126_v16 = vld [vmem:[#allocation6 + $0x18] sm:$0xff]  ;;  %v125_v17 = vld [vmem:[#allocation6 + $0x10] sm:$0xff]  ;;  %v124_v18 = vld [vmem:[#allocation6 + $0x8] sm:$0xff]  ;;  %481 = vmatprep.mubr.msk.f32.mxu1 %vm614_vm4, %v610_v0  ;;  %s361_s23 = sshll.u32 %s615_s22, 4  ;;  %s362_s23 = int_to_ptr.vmem [resolvable:$true] %s361_s23 }
  0x39   :  { %415 = vmatprep.subr.mxu0 %v136_v5  ;;  %v123_v19 = vld [vmem:[#allocation6] sm:$0xff]  ;;  %v268_v31 = vld [vmem:[#allocation9 + $0x68] sm:$0xff]  ;;  %v267_v32 = vld [vmem:[#allocation9 + $0x60] sm:$0xff]  ;;  %p581_p7 = scmp.lt.s32.totalorder %s362_s23, %s362_s23 }
  0x3a   :  { %416 = vmatpush3.msra.mxu0 %v136_v5  ;;  %v269_v30 = vld [vmem:[#allocation9 + $0x70] sm:$0xff]  ;;  %v266_v33 = vld [vmem:[#allocation9 + $0x58] sm:$0xff]  ;;  %v264_v35 = vld [vmem:[#allocation9 + $0x48] sm:$0xff] }
  0x3b   :  { %103 = vrot.lane.b32.xlu0 %v86_v2, %s613_s17  ;;  %112 = vrot.lane.b32.xlu1 %v86_v2, %s612_s4  ;;  %v265_v34 = vld [vmem:[#allocation9 + $0x50] sm:$0xff]  ;;  %v263_v36 = vld [vmem:[#allocation9 + $0x40] sm:$0xff]  ;;  %v262_v37 = vld [vmem:[#allocation9 + $0x38] sm:$0xff] }
  0x3c   :  { %417 = vmatprep.subr.mxu0 %v135_v7  ;;  %v120_v26 = vld [vmem:[#allocation2 + $0x8] sm:$0xff]  ;;  %v122_v28 = vld [vmem:[#allocation2 + $0x18] sm:$0xff]  ;;  %452 = vmatpush3.msra.mxu1 %v269_v30  ;;  %v261_v38 = vld [vmem:[#allocation9 + $0x30] sm:$0xff] }
  0x3d   :  { %418 = vmatpush3.msra.mxu0 %v135_v7  ;;  %453 = vmatprep.subr.mxu1 %v610_v0  ;;  %v260_v39 = vld [vmem:[#allocation9 + $0x28] sm:$0xff]  ;;  %v259_v40 = vld [vmem:[#allocation9 + $0x20] sm:$0xff]  ;;  %v258_v41 = vld [vmem:[#allocation9 + $0x18] sm:$0xff] }
  0x3e   :  { %419 = vmatprep.subr.mxu0 %v134_v8  ;;  %454 = vmatpush3.msra.mxu1 %v268_v31  ;;  %v257_v42 = vld [vmem:[#allocation9 + $0x10] sm:$0xff]  ;;  %v256_v43 = vld [vmem:[#allocation9 + $0x8] sm:$0xff]  ;;  %v255_v44 = vld [vmem:[#allocation9] sm:$0xff] }
  0x3f   :  { %420 = vmatpush3.msra.mxu0 %v134_v8  ;;  %455 = vmatprep.subr.mxu1 %v610_v0  ;;  %v225_v46 = vld [vmem:[#allocation8 + $0x8] sm:$0xff]  ;;  %v224_v47 = vld [vmem:[#allocation8] sm:$0xff]  ;;  %v372_v4 = vld [vmem:[%s709_s2] ss:$0 sm:$0xff]  ;;  %s576_s2 = scalar_lea.vmem %s362_s23, 32 }
  0x40   :  { %421 = vmatprep.subr.mxu0 %v133_v9  ;;  %456 = vmatpush3.msra.mxu1 %v267_v32  ;;  %p577_p6 = scmp.ne.s32.totalorder %s362_s23, %s576_s2  ;;  %p582_p8 = scmp.lt.s32.totalorder %s576_s2, %s576_s2 }
  0x41   :  { %422 = vmatpush3.msra.mxu0 %v133_v9  ;;  %457 = vmatprep.subr.mxu1 %v610_v0 }
  0x42   :  { %423 = vmatprep.subr.mxu0 %v132_v10  ;;  %458 = vmatpush3.msra.mxu1 %v266_v33  ;;  %p583_p9 = por %p582_p8, %p581_p7 }
  0x43   :  { %424 = vmatpush3.msra.mxu0 %v132_v10  ;;  %459 = vmatprep.subr.mxu1 %v610_v0 }
  0x44   :  { %425 = vmatprep.subr.mxu0 %v131_v11  ;;  %460 = vmatpush3.msra.mxu1 %v265_v34  ;;  %p584_p10 = pnand %p583_p9, %p577_p6 }
  0x45   :  { %426 = vmatpush3.msra.mxu0 %v131_v11  ;;  %461 = vmatprep.subr.mxu1 %v610_v0 }
  0x46   :  { %427 = vmatprep.subr.mxu0 %v130_v12  ;;  %462 = vmatpush3.msra.mxu1 %v264_v35 }
  0x47   :  { %428 = vmatpush3.msra.mxu0 %v130_v12  ;;  %463 = vmatprep.subr.mxu1 %v610_v0  ;;  %v373_v12 = vld [vmem:[%s712_s5] ss:$0 sm:$0xff] }
  0x48   :  { %429 = vmatprep.subr.mxu0 %v129_v13  ;;  %464 = vmatpush3.msra.mxu1 %v263_v36 }
  0x49   :  { %430 = vmatpush3.msra.mxu0 %v129_v13  ;;  %465 = vmatprep.subr.mxu1 %v610_v0 }
  0x4a   :  { %431 = vmatprep.subr.mxu0 %v128_v14  ;;  %466 = vmatpush3.msra.mxu1 %v262_v37 }
  0x4b   :  { %432 = vmatpush3.msra.mxu0 %v128_v14  ;;  %467 = vmatprep.subr.mxu1 %v610_v0 }
  0x4c   :  { %433 = vmatprep.subr.mxu0 %v127_v15  ;;  %468 = vmatpush3.msra.mxu1 %v261_v38 }
  0x4d   :  { %434 = vmatpush3.msra.mxu0 %v127_v15  ;;  %469 = vmatprep.subr.mxu1 %v610_v0 }
  0x4e   :  { %435 = vmatprep.subr.mxu0 %v126_v16  ;;  %470 = vmatpush3.msra.mxu1 %v260_v39 }
  0x4f   :  { %436 = vmatpush3.msra.mxu0 %v126_v16  ;;  %471 = vmatprep.subr.mxu1 %v610_v0 }
  0x50   :  { %437 = vmatprep.subr.mxu0 %v125_v17  ;;  %472 = vmatpush3.msra.mxu1 %v259_v40 }
  0x51   :  { %438 = vmatpush3.msra.mxu0 %v125_v17  ;;  %473 = vmatprep.subr.mxu1 %v610_v0 }
  0x52   :  { %439 = vmatprep.subr.mxu0 %v124_v18  ;;  %474 = vmatpush3.msra.mxu1 %v258_v41 }
  0x53   :  { %440 = vmatpush3.msra.mxu0 %v124_v18  ;;  %475 = vmatprep.subr.mxu1 %v610_v0 }
  0x54   :  { %441 = vmatprep.subr.mxu0 %v123_v19  ;;  %476 = vmatpush3.msra.mxu1 %v257_v42 }
  0x55   :  { %442 = vmatpush3.msra.mxu0 %v123_v19  ;;  %477 = vmatprep.subr.mxu1 %v610_v0 }
  0x56   :  { %478 = vmatpush3.msra.mxu1 %v256_v43 }
  0x57   :  { %479 = vmatprep.subr.mxu1 %v610_v0 }
  0x58   :  { %480 = vmatpush3.msra.mxu1 %v255_v44 }
  0xa5   :  { %v93_v20 = vpop.permute.xlu0 %92  ;;  %v111_v21 = vpop.permute.xlu1 %110 }
  0xa6   :  { %99 = vst.msk [vmem:[#allocation2] sm:$0xff] %vm98_vm1, %v93_v20 }
  0xa9   :  { %v102_v22 = vpop.permute.xlu0 %101  ;;  %v95_v23 = vpop.permute.xlu1 %94 }
  0xaa   :  { %108 = vst.msk [vmem:[#allocation2 - $0x1] sm:$0xfe] %vm107_vm2, %v102_v22 }
  0xab   :  { %100 = vst.msk [vmem:[#allocation2 + $0x10] sm:$0xff] %vm98_vm1, %v95_v23 }
  0xac   :  { %117 = vst.msk [vmem:[#allocation2 - $0x2] sm:$0xfc] %vm116_vm3, %v111_v21 }
  0xad   :  { %v104_v24 = vpop.permute.xlu0 %103  ;;  %v113_v25 = vpop.permute.xlu1 %112 }
  0xae   :  { %109 = vst.msk [vmem:[#allocation2 + $0xf] sm:$0xfe] %vm107_vm2, %v104_v24 }
  0xaf   :  { %118 = vst.msk [vmem:[#allocation2 + $0xe] sm:$0xfc] %vm116_vm3, %v113_v25 }
  0xb3   :  { %v119_v27 = vld [vmem:[#allocation2] sm:$0xff] }
  0xb4   :  { %443 = vmatprep.mubr.f32.mxu0 %v119_v27 }
  0xb5   :  { %444 = vmatmul.mubr.f32.vlgmr.msra.gmra.mxu0 %v120_v26 }
  0xb6   :  { %v121_v29 = vld [vmem:[#allocation2 + $0x10] sm:$0xff] }
  0xb7   :  { %446 = vmatprep.mubr.f32.mxu0 %v121_v29 }
  0xb9   :  { %447 = vmatmul.mubr.f32.gmra.mxu0 %v122_v28 }
 0x175   :  { %v445_v45 = vpop.f32.mrf.mxu0 }
 0x176   :  { %v227_v49 = vadd.f32 %v445_v45, %v225_v46 }
 0x177   :  { %v205_v48 = vpop.f32.mrf.mxu0 }
 0x178   :  { %v226_v50 = vadd.f32 %v224_v47, %v205_v48 }
 0x179   :  { %v448_v51 = vpop.f32.mrf.mxu0 }
 0x17a   :  { %v230_v52 = vmax.f32 %v226_v50, %v227_v49  ;;  %v229_v55 = vadd.f32 %v448_v51, %v225_v46 }
 0x17b   :  { %v215_v53 = vpop.f32.mrf.mxu0 }
 0x17c   :  { %v231_v54 = vrot.slane %v230_v52, 4  ;;  %v228_v56 = vadd.f32 %v224_v47, %v215_v53 }
 0x17e   :  { %v232_v57 = vmax.f32 %v230_v52, %v231_v54  ;;  %v237_v58 = vmax.f32 %v228_v56, %v229_v55 }
 0x180   :  { %v233_v59 = vrot.slane %v232_v57, 2  ;;  %v238_v60 = vrot.slane %v237_v58, 4 }
 0x182   :  { %v234_v61 = vmax.f32 %v232_v57, %v233_v59  ;;  %v239_v62 = vmax.f32 %v237_v58, %v238_v60 }
 0x184   :  { %v235_v63 = vrot.slane %v234_v61, 1  ;;  %v240_v0 = vrot.slane %v239_v62, 2 }
 0x186   :  { %v241_v1 = vmax.f32 %v239_v62, %v240_v0  ;;  %v236_v2 = vmax.f32 %v234_v61, %v235_v63 }
 0x188   :  { %v242_v3 = vrot.slane %v241_v1, 1  ;;  %v251_v6 = vadd.f32 %v372_v4, %v236_v2 }
 0x18a   :  { %v243_v5 = vmax.f32 %v241_v1, %v242_v3  ;;  %v253_v9 = vmax.f32 %v251_v6, 0.0 }
 0x18c   :  { %v252_v7 = vadd.f32 %v372_v4, %v243_v5 }
 0x18e   :  { %v254_v8 = vmax.f32 %v252_v7, 0.0 }
 0x190   :  { %v280_v10 = vrot.slane %v254_v8, 7 }
 0x192   :  { %v282_v11 = vsel %vm281_vm5, %v280_v10, %v253_v9 }
 0x193   :  { %482 = vmatmul.mubr.f32.vlgmr.msra.gmra.mxu1 %v282_v11 }
 0x253   :  { %v350_v13 = vpop.f32.mrf.mxu1 }
 0x254   :  { %v351_v14 = vadd.f32 %v373_v12, %v350_v13 }
 0x255   :  { %v483_v15 = vpop.f32.mrf.mxu1 }
 0x256   :  { %354 = vst [vmem:[#allocation11] sm:$0x3] %v351_v14 }
 0x257   :  { %587 = shalt.err (!%p584_p10)
}
 0x258   :  { %364 = dma.vmem_to_hbm [thread:$0]  %s362_s23, 32, %s713_s6, [#allocation5]  }
 0x259   :  { %602 = dma.done.wait [#allocation5], 32  }
 0x25a   :  { %603 = vsyncadd [#allocation5], 4294967264 }
 0x25b   :  { %368 = vsyncpa [#allocation4], 1 }
 0x25c   :  { %369 = vsyncpa [#allocation7], 1 }
 0x25d   :  { %370 = vsyncpa [#allocation10], 1 }
 0x25e   :  { %371 = vsyncpa [#allocation5], 1 }

</bundles_post_ra>
